<compile_context>
chip_gen: v7x
topology: tpu7x:2x2x1
jax: 0.10.0
libtpu: 0.0.40
codegen_flags: <defaults>
</compile_context>

<pallas_src>
import jax
import jax.numpy as jnp
from jax.experimental import pallas as pl
from jax.experimental.pallas import tpu as pltpu


def _identity_copy_kernel(x_hbm_ref, o_hbm_ref, sem):
    # Single whole-array HBM->HBM DMA.  No VMEM round trip, no grid loop.
    cp = pltpu.make_async_copy(x_hbm_ref, o_hbm_ref, sem)
    cp.start()
    cp.wait()


def rnn_identity(x: jax.Array, materialize: bool = True):
    """Pallas equivalent of RNNIdentity.forward: returns (x, None).

    materialize=False is the exact PyTorch semantics (same tensor, zero cost).
    materialize=True produces a distinct output buffer via one HBM->HBM DMA.
    """
    if not materialize:
        # True identity: no kernel, no HBM traffic.
        return x, None

    nbytes = x.size * jnp.dtype(x.dtype).itemsize
    out = pl.pallas_call(
        _identity_copy_kernel,
        out_shape=jax.ShapeDtypeStruct(x.shape, x.dtype),
        # Leave both arrays in HBM; the kernel issues the copy itself.
        in_specs=[pl.BlockSpec(memory_space=pl.ANY)],
        out_specs=pl.BlockSpec(memory_space=pl.ANY),
        scratch_shapes=[pltpu.SemaphoreType.DMA(())],
        # Pure memory op: tell XLA's scheduler so it can overlap it.
        cost_estimate=pl.CostEstimate(
            flops=0, transcendentals=0, bytes_accessed=2 * nbytes
        ),
    )(x)
    return out, None


if __name__ == "__main__":
    key = jax.random.PRNGKey(0)
    # Small shape consistent with an RNN-style input: batch=2, seq=8, hidden=32.
    x = jax.random.normal(key, (2, 8, 32), dtype=jnp.float32)

    # Exercise the Pallas kernel path (materialized copy).
    y, h = rnn_identity(x, materialize=True)
    y = jax.block_until_ready(y)

    assert h is None
    assert y.shape == x.shape and y.dtype == x.dtype
    assert bool(jnp.all(y == x))

    # Zero-cost path (exact PyTorch semantics: same array, no kernel).
    y2, h2 = rnn_identity(x, materialize=False)
    assert h2 is None and y2 is x

    print("KERNEL_OK")
</pallas_src>

<mosaic_0001>
module attributes {stable_mosaic.version = 11 : i64} {
  func.func @_identity_copy_kernel(%arg0: memref<2x8x32xf32, #tpu.memory_space<any>>, %arg1: memref<2x8x32xf32, #tpu.memory_space<any>>, %arg2: memref<!tpu.dma_semaphore, #tpu.memory_space<semaphore_mem>>) attributes {dimension_semantics = [], scalar_prefetch = 0 : i64, scratch_operands = 1 : i64, tpu.core_type = #tpu.core_type<tc>} {
    tpu.enqueue_dma source(%arg0 : memref<2x8x32xf32, #tpu.memory_space<any>>) target(%arg1 : memref<2x8x32xf32, #tpu.memory_space<any>>) target_semaphore(%arg2 : memref<!tpu.dma_semaphore, #tpu.memory_space<semaphore_mem>>)
    tpu.wait_dma2 semaphore(%arg2 : memref<!tpu.dma_semaphore, #tpu.memory_space<semaphore_mem>>) src(%arg0 : memref<2x8x32xf32, #tpu.memory_space<any>>) dst(%arg1 : memref<2x8x32xf32, #tpu.memory_space<any>>)
    return
  }
}

</mosaic_0001>

<bundles_post_ra>
// kernel: tpu_custom_call.1
= control target key start
LH: loop header
LB: loop body
LE: loop exit
PB: predicated region body
PF: predicated region fallthrough
CT: control target
= control target key end

     0   :  { %s35_s6 = smov [#allocation2]   ;;  %s36_s7 = smov [#allocation3]   ;;  %s54_s0 = inlined_call_operand.hbm [shape: f32[2,8,32], index: 0, kind: input, shape index: {}]   ;;  %s55_s1 = inlined_call_operand.hbm [shape: f32[2,8,32], index: 1, kind: output, shape index: {}]  }
   0x1   :  { %s37_s8 = smov 0  }
   0x2   :  { %18 = dma.general %s54_s0, 256, %s55_s1, %s35_s6, %s36_s7, [#allocation4], %s37_s8, 0  }
   0x3   :  { %33 = dma.done.wait [#allocation2], 256 }
   0x4   :  { %34 = vsyncadd [#allocation2], 4294967040 }
   0x5   :  { %23 = vsyncmov [#allocation2] }
   0x8   :  { %s24_s13 = vpop.sfrf %23 }
   0x9   :  { %p29_p0 = scmp.ne.s32.totalorder %s24_s13, 0 }
   0xb   :  { %28 = shalt.err (%p29_p0)  }

</bundles_post_ra>
